<compile_context>
chip_gen: v6e
topology: v6e:2x2x1
jax: 0.10.0
libtpu: 0.0.40
codegen_flags: <defaults>
</compile_context>

<pallas_src>
import math

import jax
import jax.numpy as jnp
from jax.experimental import pallas as pl
from jax.experimental.pallas import tpu as pltpu

INPUT_SIZE = 256
HIDDEN_SIZE = 128
OUTPUT_SIZE = 10
TILE_B = 512              # rows per grid step (clamped for small batches)

_HIGHEST = jax.lax.Precision.HIGHEST


def _round_up(x, m):
    return ((x + m - 1) // m) * m


def mlp_kernel(x_ref, w1_ref, b1_ref, w2_ref, b2_ref, o_ref):
    # fc1 + ReLU: MXU matmul with f32 accumulation; bias add + ReLU on VPU.
    h = jnp.dot(x_ref[...], w1_ref[...],
                preferred_element_type=jnp.float32, precision=_HIGHEST)
    h = jnp.maximum(h + b1_ref[...], 0.0)            # (tb, 128) + (1, 128)
    # fc2: narrow (10-lane) output; written directly, no padding.
    o = jnp.dot(h, w2_ref[...],
                preferred_element_type=jnp.float32, precision=_HIGHEST)
    o_ref[...] = o + b2_ref[...]                     # (tb, 10) + (1, 10)


def mlp_forward(x_flat, w1, b1, w2, b2, *, tile_b=TILE_B):
    """x_flat: (B, 256) f32; w1: (256, 128); b1: (1, 128); w2: (128, 10);
    b2: (1, 10). Returns (B, 10) f32.

    Weights stay resident in VMEM across the batch grid (constant index_maps);
    only the activation tile and the small output tile stream per grid step.
    """
    B = x_flat.shape[0]
    tb = min(tile_b, _round_up(B, 8))        # MXU/sublane-friendly M tile
    n_tiles = pl.cdiv(B, tb)                 # Pallas masks the ragged edge

    return pl.pallas_call(
        mlp_kernel,
        out_shape=jax.ShapeDtypeStruct((B, OUTPUT_SIZE), jnp.float32),
        grid_spec=pl.GridSpec(
            grid=(n_tiles,),
            in_specs=[
                # activations: new tile each grid step
                pl.BlockSpec((tb, INPUT_SIZE), lambda i: (i, 0)),
                # weights / biases: constant block index -> resident in VMEM
                pl.BlockSpec((INPUT_SIZE, HIDDEN_SIZE), lambda i: (0, 0)),
                pl.BlockSpec((1, HIDDEN_SIZE), lambda i: (0, 0)),
                pl.BlockSpec((HIDDEN_SIZE, OUTPUT_SIZE), lambda i: (0, 0)),
                pl.BlockSpec((1, OUTPUT_SIZE), lambda i: (0, 0)),
            ],
            out_specs=pl.BlockSpec((tb, OUTPUT_SIZE), lambda i: (i, 0)),
        ),
        compiler_params=pltpu.CompilerParams(
            # batch tiles are independent -> shard across TCs on v7x
            dimension_semantics=("parallel",),
        ),
    )(x_flat, w1, b1, w2, b2)


def init_params(key):
    """Deterministic init mirroring the torch module's _initialize_weights.

    kaiming_uniform_ with fan_in:
      relu   -> gain = sqrt(2), bound = gain * sqrt(3 / fan_in)
      linear -> gain = 1
    Weights generated as (out, in) like torch, then stored transposed as
    (in_features, out_features) so the kernel computes y = x @ W + b.
    """
    k1, k2 = jax.random.split(key)

    gain_relu = math.sqrt(2.0)
    bound1 = gain_relu * math.sqrt(3.0 / INPUT_SIZE)
    w1_torch = jax.random.uniform(
        k1, (HIDDEN_SIZE, INPUT_SIZE), jnp.float32, minval=-bound1, maxval=bound1
    )
    b1 = jnp.full((1, HIDDEN_SIZE), 0.1, dtype=jnp.float32)

    gain_lin = 1.0
    bound2 = gain_lin * math.sqrt(3.0 / HIDDEN_SIZE)
    w2_torch = jax.random.uniform(
        k2, (OUTPUT_SIZE, HIDDEN_SIZE), jnp.float32, minval=-bound2, maxval=bound2
    )
    b2 = jnp.zeros((1, OUTPUT_SIZE), dtype=jnp.float32)

    return w1_torch.T, b1, w2_torch.T, b2


if __name__ == "__main__":
    key = jax.random.PRNGKey(0)
    kx, kp = jax.random.split(key)

    # (B, C, H, W) = (8, 4, 8, 8) -> nn.Flatten -> (8, 256)
    x = jax.random.normal(kx, (8, 4, 8, 8), dtype=jnp.float32)
    x_flat = x.reshape(x.shape[0], -1)

    w1, b1, w2, b2 = init_params(kp)

    out = mlp_forward(x_flat, w1, b1, w2, b2)
    out = jax.block_until_ready(out)

    # pure-JAX reference (same HIGHEST matmul precision as the kernel)
    h_ref = jnp.maximum(
        jnp.dot(x_flat, w1, precision=_HIGHEST) + b1, 0.0)
    ref = jnp.dot(h_ref, w2, precision=_HIGHEST) + b2

    assert out.shape == (8, OUTPUT_SIZE)
    assert jnp.allclose(out, ref, atol=1e-5, rtol=1e-5)

    print("KERNEL_OK")
</pallas_src>

<mosaic_0001>
module attributes {stable_mosaic.version = 11 : i64} {
  func.func @mlp_kernel(%arg0: i32, %arg1: memref<8x256xf32, #tpu.memory_space<vmem>>, %arg2: memref<256x128xf32, #tpu.memory_space<vmem>>, %arg3: memref<1x128xf32, #tpu.memory_space<vmem>>, %arg4: memref<128x10xf32, #tpu.memory_space<vmem>>, %arg5: memref<1x10xf32, #tpu.memory_space<vmem>>, %arg6: memref<8x10xf32, #tpu.memory_space<vmem>>) attributes {dimension_semantics = [#tpu.dimension_semantics<parallel>], iteration_bounds = array<i64: 1>, scalar_prefetch = 0 : i64, scratch_operands = 0 : i64, tpu.core_type = #tpu.core_type<tc>, window_params = [{transform_indices = @transform_0, window_bounds = array<i64: 8, 256>}, {pipeline_mode = #tpu.pipeline_mode<synchronous>, transform_indices = @transform_1, window_bounds = array<i64: 256, 128>}, {pipeline_mode = #tpu.pipeline_mode<synchronous>, transform_indices = @transform_2, window_bounds = array<i64: 1, 128>}, {pipeline_mode = #tpu.pipeline_mode<synchronous>, transform_indices = @transform_3, window_bounds = array<i64: 128, 10>}, {pipeline_mode = #tpu.pipeline_mode<synchronous>, transform_indices = @transform_4, window_bounds = array<i64: 1, 10>}, {transform_indices = @transform_5, window_bounds = array<i64: 8, 10>}]} {
    %c0 = arith.constant 0 : index
    %c0_0 = arith.constant 0 : index
    %0 = vector.load %arg1[%c0, %c0_0] : memref<8x256xf32, #tpu.memory_space<vmem>>, vector<8x256xf32>
    %c0_1 = arith.constant 0 : index
    %c0_2 = arith.constant 0 : index
    %1 = vector.load %arg2[%c0_1, %c0_2] : memref<256x128xf32, #tpu.memory_space<vmem>>, vector<256x128xf32>
    %cst = arith.constant dense<0.000000e+00> : vector<8x128xf32>
    %2 = tpu.matmul %0, %1, %cst {dimension_numbers = #tpu.dot_dimension_numbers<[1], [0], [0], [1], [0, 0, 1, 1], [], []>, precision = #tpu.contract_precision<fp32>} : vector<8x256xf32>, vector<256x128xf32>, vector<8x128xf32> -> vector<8x128xf32>
    %c0_3 = arith.constant 0 : index
    %c0_4 = arith.constant 0 : index
    %3 = vector.load %arg3[%c0_3, %c0_4] : memref<1x128xf32, #tpu.memory_space<vmem>>, vector<1x128xf32>
    %4 = vector.broadcast %3 : vector<1x128xf32> to vector<8x128xf32>
    %5 = arith.addf %2, %4 : vector<8x128xf32>
    %cst_5 = arith.constant 0.000000e+00 : f32
    %6 = vector.broadcast %cst_5 : f32 to vector<8x128xf32>
    %7 = arith.maximumf %5, %6 : vector<8x128xf32>
    %c0_6 = arith.constant 0 : index
    %c0_7 = arith.constant 0 : index
    %8 = vector.load %arg4[%c0_6, %c0_7] : memref<128x10xf32, #tpu.memory_space<vmem>>, vector<128x10xf32>
    %cst_8 = arith.constant dense<0.000000e+00> : vector<8x10xf32>
    %9 = tpu.matmul %7, %8, %cst_8 {dimension_numbers = #tpu.dot_dimension_numbers<[1], [0], [0], [1], [0, 0, 1, 1], [], []>, precision = #tpu.contract_precision<fp32>} : vector<8x128xf32>, vector<128x10xf32>, vector<8x10xf32> -> vector<8x10xf32>
    %c0_9 = arith.constant 0 : index
    %c0_10 = arith.constant 0 : index
    %10 = vector.load %arg5[%c0_9, %c0_10] : memref<1x10xf32, #tpu.memory_space<vmem>>, vector<1x10xf32>
    %11 = vector.broadcast %10 : vector<1x10xf32> to vector<8x10xf32>
    %12 = arith.addf %9, %11 : vector<8x10xf32>
    %c0_11 = arith.constant 0 : index
    %c0_12 = arith.constant 0 : index
    %13 = vector.load %arg6[%c0_11, %c0_12] : memref<8x10xf32, #tpu.memory_space<vmem>>, vector<8x10xf32>
    tpu.vector_store %arg6[%c0_11, %c0_12], %12 {strides = array<i32>} : memref<8x10xf32, #tpu.memory_space<vmem>>, vector<8x10xf32>,
    return
  }
  func.func @transform_0(%arg0: i32) -> (i32, i32) {
    %c0_i32 = arith.constant 0 : i32
    %c0_i32_0 = arith.constant 0 : i32
    return %arg0, %c0_i32 : i32, i32
  }
  func.func @transform_1(%arg0: i32) -> (i32, i32) {
    %c0_i32 = arith.constant 0 : i32
    %c0_i32_0 = arith.constant 0 : i32
    %c0_i32_1 = arith.constant 0 : i32
    return %c0_i32, %c0_i32_0 : i32, i32
  }
  func.func @transform_2(%arg0: i32) -> (i32, i32) {
    %c0_i32 = arith.constant 0 : i32
    %c0_i32_0 = arith.constant 0 : i32
    %c0_i32_1 = arith.constant 0 : i32
    return %c0_i32, %c0_i32_0 : i32, i32
  }
  func.func @transform_3(%arg0: i32) -> (i32, i32) {
    %c0_i32 = arith.constant 0 : i32
    %c0_i32_0 = arith.constant 0 : i32
    %c0_i32_1 = arith.constant 0 : i32
    return %c0_i32, %c0_i32_0 : i32, i32
  }
  func.func @transform_4(%arg0: i32) -> (i32, i32) {
    %c0_i32 = arith.constant 0 : i32
    %c0_i32_0 = arith.constant 0 : i32
    %c0_i32_1 = arith.constant 0 : i32
    return %c0_i32, %c0_i32_0 : i32, i32
  }
  func.func @transform_5(%arg0: i32) -> (i32, i32) {
    %c0_i32 = arith.constant 0 : i32
    %c0_i32_0 = arith.constant 0 : i32
    return %arg0, %c0_i32 : i32, i32
  }
}

</mosaic_0001>

<bundles_post_ra>
// kernel: tpu_custom_call.1
= control target key start
LH: loop header
LB: loop body
LE: loop exit
PB: predicated region body
PF: predicated region fallthrough
CT: control target
= control target key end

     0   :  { %10 = vsyncpa [#allocation3], 0  ;;  %s3257_s0 = inlined_call_operand.vmem [shape: f32[8,256], index: 0, kind: input, shape index: {}]   ;;  %s3258_s1 = inlined_call_operand.hbm [shape: f32[256,128], index: 1, kind: input, shape index: {}]   ;;  %s3259_s2 = inlined_call_operand.vmem [shape: f32[1,128], index: 2, kind: input, shape index: {}]   ;;  %s3260_s3 = inlined_call_operand.vmem [shape: f32[128,10], index: 3, kind: input, shape index: {}]   ;;  %s3261_s4 = inlined_call_operand.vmem [shape: f32[1,10], index: 4, kind: input, shape index: {}]   ;;  %s3262_s5 = inlined_call_operand.hbm [shape: f32[8,10], index: 5, kind: output, shape index: {}]  }
   0x1   :  { %11 = vsyncpa [#allocation4], 0  ;;  %s2194_s18 = smov [#allocation2]  }
   0x2   :  { %s19_s19 = sshll.u32 %s2194_s18, 4  ;;  %s20_s19 = int_to_ptr.vmem [resolvable:$true] %s19_s19 }
   0x3   :  { %s2158_s20 = scalar_lea.vmem %s20_s19, 4096  ;;  %p2163_p1 = scmp.lt.s32.totalorder %s20_s19, %s20_s19 }
   0x4   :  { %p2159_p0 = scmp.ne.s32.totalorder %s20_s19, %s2158_s20  ;;  %p2164_p2 = scmp.lt.s32.totalorder %s2158_s20, %s2158_s20 }
   0x6   :  { %p2165_p3 = por %p2164_p2, %p2163_p1 }
   0x8   :  { %p2166_p4 = pnand %p2165_p3, %p2159_p0 }
   0xa   :  { %2169 = shalt.err (!%p2166_p4)
}
   0xb   :  { %s2195_s21 = smov 128   ;;  %s2196_s22 = smov 8  }
   0xc   :  { %25 = dma.hbm_to_vmem [thread:$0]  %s3258_s1, 4096, %s20_s19, [#allocation3], %s2195_s21, %s2195_s21, %s2196_s22  }
   0xd   :  { %2190 = dma.done.wait [#allocation3], 4096  }
   0xe   :  { %2191 = vsyncadd [#allocation3], 4294963200  ;;  %v68_v0 = vld [vmem:[#allocation2 + $0xf8] sm:$0xff]  ;;  %v67_v2 = vld [vmem:[#allocation2 + $0xf0] sm:$0xff]  ;;  %vm2198_vm0 = vmmov 0   ;;  %s2199_s9 = smov [#allocation5]  }
   0xf   :  { %v52_v1 = vld [vmem:[#allocation2 + $0x78] sm:$0xff]  ;;  %v2233_v3 = vand.u32 4294901760, %v68_v0  ;;  %v2237_v5 = vand.u32 4294901760, %v67_v2  ;;  %v51_v6 = vld [vmem:[#allocation2 + $0x70] sm:$0xff]  ;;  %v66_v7 = vld [vmem:[#allocation2 + $0xe8] sm:$0xff]  ;;  %s1611_s10 = sshll.u32 %s2199_s9, 4  ;;  %s1612_s10 = int_to_ptr.vmem [resolvable:$true] %s1611_s10 }
  0x10   :  { %v2235_v4 = vand.u32 4294901760, %v52_v1  ;;  %v50_v8 = vld [vmem:[#allocation2 + $0x68] sm:$0xff]  ;;  %v2239_v9 = vand.u32 4294901760, %v51_v6  ;;  %v2241_v10 = vand.u32 4294901760, %v66_v7  ;;  %v65_v12 = vld [vmem:[#allocation2 + $0xe0] sm:$0xff]  ;;  %v64_v14 = vld [vmem:[#allocation2 + $0xd8] sm:$0xff]  ;;  %p2175_p6 = scmp.lt.s32.totalorder %s1612_s10, %s1612_s10 }
  0x11   :  { %v2243_v11 = vand.u32 4294901760, %v50_v8  ;;  %v49_v13 = vld [vmem:[#allocation2 + $0x60] sm:$0xff]  ;;  %1622 = vmatprep.subr.mxu0 %v2233_v3  ;;  %v2246_v15 = vand.u32 4294901760, %v65_v12  ;;  %v2250_v17 = vand.u32 4294901760, %v64_v14  ;;  %v2253_v18 = vsub.f32 %v68_v0, %v2233_v3  ;;  %v2255_v19 = vld [vmem:[#allocation2 + $0x58] sm:$0xff]  ;;  %v2257_v20 = vld [vmem:[#allocation2 + $0xd0] sm:$0xff] }
  0x12   :  { %v2248_v16 = vand.u32 4294901760, %v49_v13  ;;  %v2259_v21 = vld [vmem:[#allocation2 + $0x50] sm:$0xff]  ;;  %1623 = vmatpush3.msra.mxu0 %v2235_v4  ;;  %v2263_v22 = vand.u32 4294901760, %v2255_v19  ;;  %v2266_v23 = vsub.f32 %v52_v1, %v2235_v4  ;;  %v2269_v24 = vand.u32 4294901760, %v2257_v20  ;;  %v2274_v26 = vld [vmem:[#allocation2 + $0xc8] sm:$0xff]  ;;  %v2278_v28 = vld [vmem:[#allocation2 + $0xc0] sm:$0xff] }
  0x13   :  { %v2272_v25 = vsub.f32 %v67_v2, %v2237_v5  ;;  %v2276_v27 = vld [vmem:[#allocation2 + $0x48] sm:$0xff]  ;;  %1624 = vmatprep.subr.mxu0 %v2237_v5  ;;  %v3276_v29 = vand.u32 4294901760, %v2253_v18  ;;  %v2283_v30 = vand.u32 4294901760, %v2259_v21  ;;  %v2286_v31 = vsub.f32 %v51_v6, %v2239_v9  ;;  %v2300_v37 = vld [vmem:[#allocation2 + $0x40] sm:$0xff]  ;;  %v2324_v46 = vld [vmem:[#allocation2 + $0xb8] sm:$0xff]  ;;  %s2170_s11 = scalar_lea.vmem %s1612_s10, 128 }
  0x14   :  { %v2289_v32 = vand.u32 4294901760, %v2274_v26  ;;  %1625 = vmatpush3.msra.mxu0 %v2239_v9  ;;  %v3274_v33 = vand.u32 4294901760, %v2266_v23  ;;  %v2295_v35 = vsub.f32 %v66_v7, %v2241_v10  ;;  %v2298_v36 = vand.u32 4294901760, %v2276_v27  ;;  %v2334_v51 = vld [vmem:[#allocation2 + $0x38] sm:$0xff]  ;;  %v2341_v56 = vld [vmem:[#allocation2 + $0xb0] sm:$0xff]  ;;  %v2365_v2 = vld [vmem:[#allocation2 + $0xa8] sm:$0xff]  ;;  %p2171_p5 = scmp.ne.s32.totalorder %s1612_s10, %s2170_s11  ;;  %p2176_p7 = scmp.lt.s32.totalorder %s2170_s11, %s2170_s11 }
  0x15   :  { %3342 = vst [vmem:[#allocation8_spill] sm:$0xff] %v2283_v30  ;;  %v3273_v34 = vand.u32 4294901760, %v2272_v25  ;;  %1626 = vmatprep.subr.mxu0 %v2241_v10  ;;  %v304_v38 = vsub.f32 %v2253_v18, %v3276_v29  ;;  %v3271_v39 = vand.u32 4294901760, %v2286_v31  ;;  %v2308_v40 = vsub.f32 %v50_v8, %v2243_v11  ;;  %v2353_v61 = vld [vmem:[#allocation2 + $0x30] sm:$0xff] }
  0x16   :  { %3343 = vst [vmem:[#allocation9_spill] sm:$0xff] %v2289_v32  ;;  %3344 = vst [vmem:[#allocation10_spill] sm:$0xff] %v2298_v36  ;;  %v2311_v41 = vand.u32 4294901760, %v2278_v28  ;;  %1627 = vmatpush3.msra.mxu0 %v2243_v11  ;;  %v192_v42 = vsub.f32 %v2266_v23, %v3274_v33  ;;  %v3269_v44 = vand.u32 4294901760, %v2295_v35  ;;  %v2322_v45 = vsub.f32 %v65_v12, %v2246_v15  ;;  %p2177_p8 = por %p2176_p7, %p2175_p6 }
  0x17   :  { %v311_v43 = vsub.f32 %v2272_v25, %v3273_v34  ;;  %1628 = vmatprep.subr.mxu0 %v2246_v15  ;;  %v305_v47 = vand.u32 4294901760, %v304_v38  ;;  %v199_v48 = vsub.f32 %v2286_v31, %v3271_v39  ;;  %v3268_v49 = vand.u32 4294901760, %v2308_v40  ;;  %v2456_v39 = vld [vmem:[#allocation2 + $0x90] sm:$0xff] }
  0x18   :  { %3345 = vst [vmem:[#allocation11_spill] sm:$0xff] %v2311_v41  ;;  %v2332_v50 = vand.u32 4294901760, %v2300_v37  ;;  %1629 = vmatpush3.msra.mxu0 %v2248_v16  ;;  %v193_v52 = vand.u32 4294901760, %v192_v42  ;;  %v318_v54 = vsub.f32 %v2295_v35, %v3269_v44  ;;  %v3266_v55 = vand.u32 4294901760, %v2322_v45  ;;  %v2466_v34 = vld [vmem:[#allocation2 + $0x10] sm:$0xff]  ;;  %p2178_p9 = pnand %p2177_p8, %p2171_p5 }
  0x19   :  { %v312_v53 = vand.u32 4294901760, %v311_v43  ;;  %1630 = vmatprep.subr.mxu0 %v2250_v17  ;;  %1657 = vmatprep.subr.mxu1 %v305_v47  ;;  %v200_v57 = vand.u32 4294901760, %v199_v48  ;;  %v206_v58 = vsub.f32 %v2308_v40, %v3268_v49  ;;  %v2348_v59 = vsub.f32 %v49_v13, %v2248_v16  ;;  %v2376_v13 = vld [vmem:[#allocation2 + $0x28] sm:$0xff]  ;;  %v2443_v49 = vld [vmem:[#allocation2 + $0x18] sm:$0xff] }
  0x1a   :  { %3346 = vst [vmem:[#allocation12_spill] sm:$0xff] %v2332_v50  ;;  %v2351_v60 = vand.u32 4294901760, %v2324_v46  ;;  %1631 = vmatpush3.msra.mxu0 %v2263_v22  ;;  %1658 = vmatpush3.msra.mxu1 %v193_v52  ;;  %v319_v62 = vand.u32 4294901760, %v318_v54  ;;  %v325_v63 = vsub.f32 %v2322_v45, %v3266_v55  ;;  %v2360_v0 = vsub.f32 %v64_v14, %v2250_v17 }
  0x1b   :  { %v2363_v1 = vand.u32 4294901760, %v2334_v51  ;;  %1632 = vmatprep.subr.mxu0 %v2269_v24  ;;  %1659 = vmatprep.subr.mxu1 %v312_v53  ;;  %v207_v6 = vand.u32 4294901760, %v206_v58  ;;  %v3264_v7 = vand.u32 4294901760, %v2348_v59  ;;  %v2371_v8 = vsub.f32 %v2255_v19, %v2263_v22 }
  0x1c   :  { %3347 = vst [vmem:[#allocation13_spill] sm:$0xff] %v2351_v60  ;;  %v2374_v12 = vand.u32 4294901760, %v2341_v56  ;;  %1633 = vmatpush3.msra.mxu0 %v2283_v30  ;;  %1660 = vmatpush3.msra.mxu1 %v200_v57  ;;  %v326_v14 = vand.u32 4294901760, %v325_v63  ;;  %v3263_v38 = vand.u32 4294901760, %v2360_v0  ;;  %v2382_v42 = vsub.f32 %v2257_v20, %v2269_v24  ;;  %v2399_v20 = vld [vmem:[#allocation2 + $0xa0] sm:$0xff] }
  0x1d   :  { %3348 = vst [vmem:[#allocation14_spill] sm:$0xff] %v2363_v1  ;;  %v2385_v43 = vand.u32 4294901760, %v2353_v61  ;;  %1634 = vmatprep.subr.mxu0 %v2289_v32  ;;  %1661 = vmatprep.subr.mxu1 %v319_v62  ;;  %v213_v19 = vsub.f32 %v2348_v59, %v3264_v7  ;;  %v3265_v47 = vand.u32 4294901760, %v2371_v8  ;;  %v2394_v48 = vsub.f32 %v2259_v21, %v2283_v30 }
  0x1e   :  { %3349 = vst [vmem:[#allocation15_spill] sm:$0xff] %v2374_v12  ;;  %v2397_v52 = vand.u32 4294901760, %v2365_v2  ;;  %1635 = vmatpush3.msra.mxu0 %v2298_v36  ;;  %1662 = vmatpush3.msra.mxu1 %v207_v6  ;;  %v332_v53 = vsub.f32 %v2360_v0, %v3263_v38  ;;  %v3267_v54 = vand.u32 4294901760, %v2382_v42  ;;  %v2408_v57 = vsub.f32 %v2274_v26, %v2289_v32  ;;  %v2422_v38 = vld [vmem:[#allocation2 + $0x20] sm:$0xff] }
  0x1f   :  { %3350 = vst [vmem:[#allocation16_spill] sm:$0xff] %v2385_v43  ;;  %v2411_v21 = vand.u32 4294901760, %v2376_v13  ;;  %1636 = vmatprep.subr.mxu0 %v2311_v41  ;;  %1663 = vmatprep.subr.mxu1 %v326_v14  ;;  %v214_v58 = vand.u32 4294901760, %v213_v19  ;;  %v220_v62 = vsub.f32 %v2371_v8, %v3265_v47  ;;  %v3270_v63 = vand.u32 4294901760, %v2394_v48  ;;  %v2432_v47 = vld [vmem:[#allocation2 + $0x98] sm:$0xff] }
  0x20   :  { %3351 = vst [vmem:[#allocation17_spill] sm:$0xff] %v2397_v52  ;;  %v2420_v6 = vsub.f32 %v2276_v27, %v2298_v36  ;;  %1637 = vmatpush3.msra.mxu0 %v2332_v50  ;;  %v333_v26 = vand.u32 4294901760, %v332_v53  ;;  %v339_v14 = vsub.f32 %v2382_v42, %v3267_v54  ;;  %v3272_v19 = vand.u32 4294901760, %v2408_v57 }
  0x21   :  { %3352 = vst [vmem:[#allocation18_spill] sm:$0xff] %v2411_v21  ;;  %v2430_v7 = vand.u32 4294901760, %v2399_v20  ;;  %1664 = vmatpush3.msra.mxu1 %v214_v58  ;;  %1638 = vmatprep.subr.mxu0 %v2351_v60  ;;  %v221_v27 = vand.u32 4294901760, %v220_v62  ;;  %v227_v55 = vsub.f32 %v2394_v48, %v3270_v63  ;;  %v2441_v54 = vsub.f32 %v2278_v28, %v2311_v41 }
  0x22   :  { %v3275_v53 = vand.u32 4294901760, %v2420_v6  ;;  %1665 = vmatprep.subr.mxu1 %v333_v26  ;;  %1639 = vmatpush3.msra.mxu0 %v2363_v1  ;;  %v340_v44 = vand.u32 4294901760, %v339_v14  ;;  %v346_v58 = vsub.f32 %v2408_v57, %v3272_v19  ;;  %v2450_v62 = vand.u32 4294901760, %v2422_v38 }
  0x23   :  { %3353 = vst [vmem:[#allocation19_spill] sm:$0xff] %v2430_v7  ;;  %v2454_v63 = vsub.f32 %v2300_v37, %v2332_v50  ;;  %1666 = vmatpush3.msra.mxu1 %v221_v27  ;;  %1640 = vmatprep.subr.mxu0 %v2374_v12  ;;  %v228_v28 = vand.u32 4294901760, %v227_v55  ;;  %v3279_v14 = vand.u32 4294901760, %v2441_v54  ;;  %v2464_v19 = vand.u32 4294901760, %v2432_v47 }
  0x24   :  { %3354 = vst [vmem:[#allocation20_spill] sm:$0xff] %v2450_v62  ;;  %v234_v26 = vsub.f32 %v2420_v6, %v3275_v53  ;;  %1667 = vmatprep.subr.mxu1 %v340_v44  ;;  %1641 = vmatpush3.msra.mxu0 %v2385_v43  ;;  %v347_v37 = vand.u32 4294901760, %v346_v58  ;;  %v2472_v55 = vsub.f32 %v2324_v46, %v2351_v60  ;;  %v2475_v33 = vand.u32 4294901760, %v2443_v49  ;;  %v2477_v53 = vld [vmem:[#allocation2 + $0x88] sm:$0xff] }
  0x25   :  { %v3282_v27 = vand.u32 4294901760, %v2454_v63  ;;  %1668 = vmatpush3.msra.mxu1 %v228_v28  ;;  %1642 = vmatprep.subr.mxu0 %v2397_v52  ;;  %v353_v44 = vsub.f32 %v2441_v54, %v3279_v14  ;;  %v2485_v58 = vsub.f32 %v2334_v51, %v2363_v1  ;;  %v2488_v46 = vand.u32 4294901760, %v2456_v39  ;;  %v2502_v51 = vld [vmem:[#allocation2 + $0x8] sm:$0xff] }
  0x26   :  { %3355 = vst [vmem:[#allocation21_spill] sm:$0xff] %v2475_v33  ;;  %v235_v29 = vand.u32 4294901760, %v234_v26  ;;  %1669 = vmatprep.subr.mxu1 %v347_v37  ;;  %1643 = vmatpush3.msra.mxu0 %v2411_v21  ;;  %v2497_v60 = vsub.f32 %v2341_v56, %v2374_v12  ;;  %v2500_v14 = vand.u32 4294901760, %v2466_v34  ;;  %v2511_v26 = vand.u32 4294901760, %v2477_v53  ;;  %v2513_v56 = vld [vmem:[#allocation2 + $0x80] sm:$0xff] }
  0x27   :  { %3356 = vst [vmem:[#allocation22_spill] sm:$0xff] %v2488_v46  ;;  %v241_v28 = vsub.f32 %v2454_v63, %v3282_v27  ;;  %1644 = vmatprep.subr.mxu0 %v2430_v7  ;;  %v354_v37 = vand.u32 4294901760, %v353_v44  ;;  %v2508_v27 = vsub.f32 %v2353_v61, %v2385_v43  ;;  %v3360_v50 = vand.u32 4294901760, %v2472_v55  ;;  %v2536_v44 = vld [vmem:[#allocation2] sm:$0xff] }
  0x28   :  { %3357 = vst [vmem:[#allocation23_spill] sm:$0xff] %v2500_v14  ;;  %1670 = vmatpush3.msra.mxu1 %v235_v29  ;;  %3359 = vst [vmem:[#allocation25_spill] sm:$0xff] %v2511_v26  ;;  %1645 = vmatpush3.msra.mxu0 %v2450_v62  ;;  %v2522_v1 = vsub.f32 %v2365_v2, %v2397_v52  ;;  %v3362_v61 = vand.u32 4294901760, %v2485_v58  ;;  %v2544_v41 = vand.u32 4294901760, %v2513_v56  ;;  %vm1603_vm1 = vcmask 80896  }
  0x29   :  { %3358 = vst [vmem:[#allocation24_spill] sm:$0xff] %v2508_v27  ;;  %v242_v12 = vand.u32 4294901760, %v241_v28  ;;  %v360_v29 = vsub.f32 %v2472_v55, %v3360_v50  ;;  %1671 = vmatprep.subr.mxu1 %v354_v37  ;;  %1646 = vmatprep.subr.mxu0 %v2464_v19  ;;  %v2530_v28 = vand.u32 4294901760, %v2502_v51  ;;  %v2534_v50 = vsub.f32 %v2376_v13, %v2411_v21  ;;  %v36_v13 = vld [vmem:[%s3257_s0 + $0x8] sm:$0xff] }
  0x2a   :  { %3361 = vst [vmem:[#allocation26_spill] sm:$0xff] %v2522_v1  ;;  %v248_v43 = vsub.f32 %v2485_v58, %v3362_v61  ;;  %1647 = vmatpush3.msra.mxu0 %v2475_v33  ;;  %v3363_v37 = vand.u32 4294901760, %v2497_v60  ;;  %v35_v61 = vld [vmem:[%s3257_s0] sm:$0xff]  ;;  %v2570_v36 = vsub.f32 %v2422_v38, %v2450_v62  ;;  %v2583_v38 = vsub.f32 %v2432_v47, %v2464_v19 }
  0x2b   :  { %1672 = vmatpush3.msra.mxu1 %v242_v12  ;;  %v361_v2 = vand.u32 4294901760, %v360_v29  ;;  %1648 = vmatprep.subr.mxu0 %v2488_v46  ;;  %v3364_v12 = vand.u32 4294901760, %v2508_v27 }
  0x2c   :  { %v367_v52 = vsub.f32 %v2497_v60, %v3363_v37  ;;  %v249_v21 = vand.u32 4294901760, %v248_v43  ;;  %v2556_v37 = vsub.f32 %v2399_v20, %v2430_v7  ;;  %1649 = vmatpush3.msra.mxu0 %v2500_v14  ;;  %v3365_v43 = vand.u32 4294901760, %v2522_v1 }
  0x2d   :  { %v255_v29 = vsub.f32 %v2508_v27, %v3364_v12  ;;  %1673 = vmatprep.subr.mxu1 %v361_v2  ;;  %v2566_v12 = vand.u32 4294901760, %v2536_v44  ;;  %1650 = vmatprep.subr.mxu0 %v2511_v26  ;;  %v3366_v2 = vand.u32 4294901760, %v2534_v50  ;;  %v2577_v27 = vand.u32 4294901760, %v36_v13 }
  0x2e   :  { %v368_v32 = vand.u32 4294901760, %v367_v52  ;;  %v374_v30 = vsub.f32 %v2522_v1, %v3365_v43  ;;  %1674 = vmatpush3.msra.mxu1 %v249_v21  ;;  %v3307_v7 = vand.u32 4294901760, %v2556_v37  ;;  %1651 = vmatpush3.msra.mxu0 %v2530_v28  ;;  %v3308_v1 = vand.u32 4294901760, %v2570_v36 }
  0x2f   :  { %v256_v20 = vand.u32 4294901760, %v255_v29  ;;  %v262_v52 = vsub.f32 %v2534_v50, %v3366_v2  ;;  %3367 = vst [vmem:[#allocation27_spill] sm:$0xff] %v2577_v27  ;;  %v2585_v21 = vand.u32 4294901760, %v35_v61  ;;  %1652 = vmatprep.subr.mxu0 %v2544_v41  ;;  %413 = vmatprep.mubr.f32.mxu1 %v2577_v27 }
  0x30   :  { %1675 = vmatprep.subr.mxu1 %v368_v32  ;;  %v375_v43 = vand.u32 4294901760, %v374_v30  ;;  %v381_v2 = vsub.f32 %v2556_v37, %v3307_v7  ;;  %v2592_v30 = vsub.f32 %v36_v13, %v2577_v27  ;;  %v2596_v32 = vsub.f32 %v2443_v49, %v2475_v33  ;;  %1653 = vmatpush3.msra.mxu0 %v2566_v12 }
  0x31   :  { %3368 = vst [vmem:[#allocation28_spill] sm:$0xff] %v2585_v21  ;;  %1676 = vmatpush3.msra.mxu1 %v256_v20  ;;  %v263_v29 = vand.u32 4294901760, %v262_v52  ;;  %v269_v47 = vsub.f32 %v2570_v36, %v3308_v1  ;;  %v2604_v52 = vsub.f32 %v35_v61, %v2585_v21  ;;  %v2608_v13 = vsub.f32 %v2456_v39, %v2488_v46 }
  0x32   :  { %1677 = vmatprep.subr.mxu1 %v375_v43  ;;  %v382_v7 = vand.u32 4294901760, %v381_v2  ;;  %v3313_v49 = vand.u32 4294901760, %v2592_v30  ;;  %1692 = vmatprep.subr.mxu0 %v2253_v18  ;;  %v3316_v43 = vand.u32 4294901760, %v2596_v32  ;;  %v2615_v1 = vsub.f32 %v2466_v34, %v2500_v14 }
  0x33   :  { %1678 = vmatpush3.msra.mxu1 %v263_v29  ;;  %v270_v20 = vand.u32 4294901760, %v269_v47  ;;  %v3369_v61 = vand.u32 4294901760, %v2583_v38  ;;  %v3370_v29 = vand.u32 4294901760, %v2604_v52  ;;  %v3371_v27 = vand.u32 4294901760, %v2608_v13 }
  0x34   :  { %1679 = vmatprep.subr.mxu1 %v382_v7  ;;  %v175_v2 = vsub.f32 %v2592_v30, %v3313_v49  ;;  %v276_v34 = vsub.f32 %v2596_v32, %v3316_v43  ;;  %v2642_v14 = vsub.f32 %v2502_v51, %v2530_v28  ;;  %v3373_v46 = vand.u32 4294901760, %v2615_v1 }
  0x35   :  { %v388_v33 = vsub.f32 %v2583_v38, %v3369_v61  ;;  %v2632_v61 = vsub.f32 %v2477_v53, %v2511_v26  ;;  %1680 = vmatpush3.msra.mxu1 %v270_v20  ;;  %v181_v7 = vsub.f32 %v2604_v52, %v3370_v29  ;;  %v395_v49 = vsub.f32 %v2608_v13, %v3371_v27 }
  0x36   :  { %3372 = vst [vmem:[#allocation29_spill] sm:$0xff] %v2642_v14  ;;  %v176_v43 = vand.u32 4294901760, %v175_v2  ;;  %v277_v47 = vand.u32 4294901760, %v276_v34  ;;  %v283_v53 = vsub.f32 %v2615_v1, %v3373_v46  ;;  %v3323_v29 = vand.u32 4294901760, %v2642_v14 }
  0x37   :  { %v389_v39 = vand.u32 4294901760, %v388_v33  ;;  %v3324_v33 = vand.u32 4294901760, %v2632_v61  ;;  %v182_v20 = vand.u32 4294901760, %v181_v7  ;;  %v396_v26 = vand.u32 4294901760, %v395_v49 }
  0x38   :  { %v2651_v27 = vsub.f32 %v2513_v56, %v2544_v41  ;;  %177 = vmatprep.mubr.f32.mxu0 %v176_v43  ;;  %v284_v51 = vand.u32 4294901760, %v283_v53  ;;  %v2658_v46 = vsub.f32 %v2536_v44, %v2566_v12  ;;  %v290_v49 = vsub.f32 %v2642_v14, %v3323_v29  ;;  %v3376_v53 = vld [vmem:[#allocation24_spill] sm:$0xff]  ;;  %v3389_v29 = vld [vmem:[#allocation19_spill] sm:$0xff] }
  0x39   :  { %1681 = vmatprep.subr.mxu1 %v389_v39  ;;  %v402_v2 = vsub.f32 %v2632_v61, %v3324_v33  ;;  %183 = vmatmul.mubr.f32.vlgmr.msra.gmra.mxu0 %v182_v20  ;;  %v3377_v20 = vld [vmem:[#allocation8_spill] sm:$0xff]  ;;  %v3390_v33 = vand.u32 4294901760, %v2253_v18  ;;  %v3398_v18 = vand.u32 4294901760, %v2295_v35 }
  0x3a   :  { %3374 = vst [vmem:[#allocation30_spill] sm:$0xff] %v2651_v27  ;;  %1682 = vmatpush3.msra.mxu1 %v277_v47  ;;  %3375 = vst [vmem:[#allocation31_spill] sm:$0xff] %v2658_v46  ;;  %v3322_v56 = vand.u32 4294901760, %v2651_v27  ;;  %1693 = vmatpush3.msra.mxu0 %v2266_v23  ;;  %v3321_v39 = vand.u32 4294901760, %v2658_v46  ;;  %v291_v34 = vand.u32 4294901760, %v290_v49  ;;  %v3380_v49 = vld [vmem:[#allocation10_spill] sm:$0xff] }
  0x3b   :  { %1683 = vmatprep.subr.mxu1 %v396_v26  ;;  %v403_v43 = vand.u32 4294901760, %v402_v2  ;;  %1694 = vmatprep.subr.mxu0 %v2272_v25  ;;  %v3379_v2 = vld [vmem:[#allocation9_spill] sm:$0xff] }
  0x3c   :  { %1684 = vmatpush3.msra.mxu1 %v284_v51  ;;  %v409_v44 = vsub.f32 %v2651_v27, %v3322_v56  ;;  %550 = vmatprep.mubr.f32.mxu0 %v2592_v30  ;;  %v297_v26 = vsub.f32 %v2658_v46, %v3321_v39  ;;  %v3378_v51 = vld [vmem:[#allocation26_spill] sm:$0xff]  ;;  %v3387_v39 = vld [vmem:[#allocation17_spill] sm:$0xff] }
  0x3d   :  { %1695 = vmatpush3.msra.mxu0 %v2286_v31  ;;  %1685 = vmatprep.subr.mxu1 %v403_v43  ;;  %v3381_v43 = vld [vmem:[#allocation11_spill] sm:$0xff]  ;;  %v3388_v56 = vld [vmem:[#allocation18_spill] sm:$0xff] }
  0x3e   :  { %1696 = vmatprep.subr.mxu0 %v2295_v35  ;;  %1686 = vmatpush3.msra.mxu1 %v291_v34  ;;  %v410_v47 = vand.u32 4294901760, %v409_v44  ;;  %v298_v7 = vand.u32 4294901760, %v297_v26  ;;  %v3382_v34 = vld [vmem:[#allocation12_spill] sm:$0xff]  ;;  %v3383_v44 = vld [vmem:[#allocation13_spill] sm:$0xff]  ;;  %v3384_v26 = vld [vmem:[#allocation14_spill] sm:$0xff]  ;;  %v3403_v35 = vand.u32 4294901760, %v2604_v52 }
  0x3f   :  { %1697 = vmatpush3.msra.mxu0 %v2308_v40 }
  0x40   :  { %1687 = vmatprep.subr.mxu1 %v410_v47  ;;  %1698 = vmatprep.subr.mxu0 %v2322_v45  ;;  %v3385_v47 = vld [vmem:[#allocation15_spill] sm:$0xff] }
  0x41   :  { %1688 = vmatpush3.msra.mxu1 %v298_v7  ;;  %1699 = vmatpush3.msra.mxu0 %v2348_v59  ;;  %v3386_v7 = vld [vmem:[#allocation16_spill] sm:$0xff] }
  0x42   :  { %415 = vmatmul.mubr.f32.vlgmr.msra.gmra.mxu1 %v2585_v21  ;;  %1700 = vmatprep.subr.mxu0 %v2360_v0  ;;  %v3391_v21 = vld [vmem:[#allocation21_spill] sm:$0xff] }
  0x43   :  { %1727 = vmatprep.subr.mxu1 %v2233_v3  ;;  %1701 = vmatpush3.msra.mxu0 %v2371_v8 }
  0x44   :  { %1728 = vmatpush3.msra.mxu1 %v2235_v4  ;;  %1702 = vmatprep.subr.mxu0 %v2382_v42 }
  0x45   :  { %1729 = vmatprep.subr.mxu1 %v2237_v5  ;;  %1703 = vmatpush3.msra.mxu0 %v2394_v48 }
  0x46   :  { %1730 = vmatpush3.msra.mxu1 %v2239_v9  ;;  %1704 = vmatprep.subr.mxu0 %v2408_v57 }
  0x47   :  { %1731 = vmatprep.subr.mxu1 %v2241_v10  ;;  %1705 = vmatpush3.msra.mxu0 %v2420_v6 }
  0x48   :  { %1732 = vmatpush3.msra.mxu1 %v2243_v11  ;;  %1706 = vmatprep.subr.mxu0 %v2441_v54 }
  0x49   :  { %1733 = vmatprep.subr.mxu1 %v2246_v15  ;;  %1707 = vmatpush3.msra.mxu0 %v2454_v63 }
  0x4a   :  { %1734 = vmatpush3.msra.mxu1 %v2248_v16  ;;  %1708 = vmatprep.subr.mxu0 %v2472_v55 }
  0x4b   :  { %1735 = vmatprep.subr.mxu1 %v2250_v17  ;;  %1709 = vmatpush3.msra.mxu0 %v2485_v58 }
  0x4c   :  { %1736 = vmatpush3.msra.mxu1 %v2263_v22  ;;  %1710 = vmatprep.subr.mxu0 %v2497_v60 }
  0x4d   :  { %1737 = vmatprep.subr.mxu1 %v2269_v24  ;;  %1711 = vmatpush3.msra.mxu0 %v3376_v53 }
  0x4e   :  { %1738 = vmatpush3.msra.mxu1 %v3377_v20  ;;  %1712 = vmatprep.subr.mxu0 %v3378_v51 }
  0x4f   :  { %1739 = vmatprep.subr.mxu1 %v3379_v2  ;;  %1713 = vmatpush3.msra.mxu0 %v2534_v50 }
  0x50   :  { %1740 = vmatpush3.msra.mxu1 %v3380_v49  ;;  %1714 = vmatprep.subr.mxu0 %v2556_v37 }
  0x51   :  { %1741 = vmatprep.subr.mxu1 %v3381_v43  ;;  %1715 = vmatpush3.msra.mxu0 %v2570_v36 }
  0x52   :  { %1742 = vmatpush3.msra.mxu1 %v3382_v34  ;;  %1716 = vmatprep.subr.mxu0 %v2583_v38 }
  0x53   :  { %1743 = vmatprep.subr.mxu1 %v3383_v44  ;;  %1717 = vmatpush3.msra.mxu0 %v2596_v32 }
  0x54   :  { %1744 = vmatpush3.msra.mxu1 %v3384_v26  ;;  %1718 = vmatprep.subr.mxu0 %v2608_v13 }
  0x55   :  { %1745 = vmatprep.subr.mxu1 %v3385_v47  ;;  %1719 = vmatpush3.msra.mxu0 %v2615_v1 }
  0x56   :  { %1746 = vmatpush3.msra.mxu1 %v3386_v7  ;;  %1720 = vmatprep.subr.mxu0 %v2632_v61 }
  0x57   :  { %1747 = vmatprep.subr.mxu1 %v3387_v39  ;;  %1721 = vmatpush3.msra.mxu0 %v2642_v14  ;;  %v3392_v14 = vand.u32 4294901760, %v2266_v23  ;;  %v3399_v23 = vand.u32 4294901760, %v2308_v40  ;;  %v3405_v40 = vand.u32 4294901760, %v2371_v8  ;;  %v3421_v8 = vand.u32 4294901760, %v2596_v32 }
  0x58   :  { %1748 = vmatpush3.msra.mxu1 %v3388_v56  ;;  %1722 = vmatprep.subr.mxu0 %v2651_v27  ;;  %v3393_v56 = vld [vmem:[#allocation22_spill] sm:$0xff]  ;;  %v3397_v27 = vld [vmem:[#allocation25_spill] sm:$0xff] }
  0x59   :  { %1749 = vmatprep.subr.mxu1 %v3389_v29  ;;  %1723 = vmatpush3.msra.mxu0 %v2658_v46  ;;  %v3394_v29 = vand.u32 4294901760, %v2272_v25  ;;  %v3395_v46 = vld [vmem:[#allocation23_spill] sm:$0xff]  ;;  %v3400_v25 = vand.u32 4294901760, %v2322_v45  ;;  %v3406_v45 = vand.u32 4294901760, %v2382_v42  ;;  %v3422_v42 = vand.u32 4294901760, %v2608_v13  ;;  %v950_v13 = vld [vmem:[%s3260_s3 + $0x58] sm:$0xff] }
  0x5a   :  { %1750 = vmatpush3.msra.mxu1 %v2450_v62  ;;  %553 = vmatmul.mubr.f32.vlgmr.msra.gmra.mxu0 %v2604_v52  ;;  %v3396_v62 = vand.u32 4294901760, %v2286_v31  ;;  %v3401_v31 = vand.u32 4294901760, %v2592_v30  ;;  %v3435_v30 = vld [vmem:[#allocation28_spill] sm:$0xff] }
  0x5b   :  { %1751 = vmatprep.subr.mxu1 %v2464_v19  ;;  %1762 = vmatprep.subr.mxu0 %v3390_v33 }
  0x5c   :  { %1752 = vmatpush3.msra.mxu1 %v3391_v21  ;;  %1763 = vmatpush3.msra.mxu0 %v3392_v14  ;;  %v3404_v14 = vand.u32 4294901760, %v2360_v0  ;;  %v3408_v0 = vand.u32 4294901760, %v2408_v57 }
  0x5d   :  { %1753 = vmatprep.subr.mxu1 %v3393_v56  ;;  %1764 = vmatprep.subr.mxu0 %v3394_v29 }
  0x5e   :  { %1754 = vmatpush3.msra.mxu1 %v3395_v46  ;;  %1765 = vmatpush3.msra.mxu0 %v3396_v62  ;;  %v3402_v62 = vand.u32 4294901760, %v2348_v59  ;;  %v3407_v59 = vand.u32 4294901760, %v2394_v48  ;;  %v3424_v48 = vand.u32 4294901760, %v2632_v61  ;;  %v2197_v61 = vmov 0.0  }
  0x5f   :  { %1755 = vmatprep.subr.mxu1 %v3397_v27  ;;  %1766 = vmatprep.subr.mxu0 %v3398_v18 }
  0x60   :  { %1756 = vmatpush3.msra.mxu1 %v2530_v28  ;;  %1767 = vmatpush3.msra.mxu0 %v3399_v23 }
  0x61   :  { %1757 = vmatprep.subr.mxu1 %v2544_v41  ;;  %1768 = vmatprep.subr.mxu0 %v3400_v25 }
  0x62   :  { %1758 = vmatpush3.msra.mxu1 %v2566_v12  ;;  %657 = vmatprep.mubr.f32.mxu1 %v3401_v31 }
  0x63   :  { %1769 = vmatpush3.msra.mxu0 %v3402_v62  ;;  %661 = vmatmul.mubr.f32.vlgmr.msra.gmra.mxu1 %v3403_v35 }
  0x64   :  { %1770 = vmatprep.subr.mxu0 %v3404_v14  ;;  %1797 = vmatprep.subr.mxu1 %v2233_v3  ;;  %v3409_v3 = vand.u32 4294901760, %v2420_v6  ;;  %v3428_v6 = vld [vmem:[#allocation30_spill] sm:$0xff] }
  0x65   :  { %1771 = vmatpush3.msra.mxu0 %v3405_v40  ;;  %1798 = vmatpush3.msra.mxu1 %v2235_v4  ;;  %v3410_v4 = vand.u32 4294901760, %v2441_v54  ;;  %v3425_v54 = vld [vmem:[#allocation29_spill] sm:$0xff] }
  0x66   :  { %1772 = vmatprep.subr.mxu0 %v3406_v45  ;;  %1799 = vmatprep.subr.mxu1 %v2237_v5  ;;  %v3411_v5 = vand.u32 4294901760, %v2454_v63  ;;  %v3426_v57 = vand.u32 4294901760, %v3425_v54  ;;  %v3427_v63 = vld [vmem:[#allocation18_spill] sm:$0xff] }
  0x67   :  { %1773 = vmatpush3.msra.mxu0 %v3407_v59  ;;  %1800 = vmatpush3.msra.mxu1 %v2239_v9  ;;  %v3412_v9 = vand.u32 4294901760, %v2472_v55  ;;  %v3429_v55 = vand.u32 4294901760, %v3428_v6 }
  0x68   :  { %1774 = vmatprep.subr.mxu0 %v3408_v0  ;;  %1801 = vmatprep.subr.mxu1 %v2241_v10  ;;  %v3413_v10 = vand.u32 4294901760, %v2485_v58  ;;  %v3430_v58 = vld [vmem:[#allocation19_spill] sm:$0xff] }
  0x69   :  { %1775 = vmatpush3.msra.mxu0 %v3409_v3  ;;  %1802 = vmatpush3.msra.mxu1 %v2243_v11  ;;  %v3414_v11 = vand.u32 4294901760, %v2497_v60  ;;  %v3420_v60 = vand.u32 4294901760, %v2583_v38  ;;  %v3434_v38 = vld [vmem:[#allocation20_spill] sm:$0xff] }
  0x6a   :  { %1776 = vmatprep.subr.mxu0 %v3410_v4  ;;  %1803 = vmatprep.subr.mxu1 %v2246_v15  ;;  %v3415_v15 = vand.u32 4294901760, %v3376_v53 }
  0x6b   :  { %1777 = vmatpush3.msra.mxu0 %v3411_v5  ;;  %1804 = vmatpush3.msra.mxu1 %v2248_v16  ;;  %v3416_v16 = vand.u32 4294901760, %v3378_v51  ;;  %v947_v5 = vld [vmem:[%s3260_s3 + $0x40] sm:$0xff] }
  0x6c   :  { %1778 = vmatprep.subr.mxu0 %v3412_v9  ;;  %1805 = vmatprep.subr.mxu1 %v2250_v17  ;;  %v3417_v17 = vand.u32 4294901760, %v2534_v50  ;;  %v3431_v50 = vld [vmem:[#allocation31_spill] sm:$0xff] }
  0x6d   :  { %1779 = vmatpush3.msra.mxu0 %v3413_v10  ;;  %1806 = vmatpush3.msra.mxu1 %v2263_v22  ;;  %v3418_v22 = vand.u32 4294901760, %v2556_v37  ;;  %v3433_v37 = vld [vmem:[#allocation27_spill] sm:$0xff] }
  0x6e   :  { %1780 = vmatprep.subr.mxu0 %v3414_v11  ;;  %1807 = vmatprep.subr.mxu1 %v2269_v24  ;;  %v3419_v24 = vand.u32 4294901760, %v2570_v36  ;;  %v3423_v36 = vand.u32 4294901760, %v2615_v1  ;;  %v3432_v1 = vand.u32 4294901760, %v3431_v50  ;;  %v2942_v11 = vand.u32 4294901760, %v947_v5 }
  0x6f   :  { %1781 = vmatpush3.msra.mxu0 %v3415_v15  ;;  %1808 = vmatpush3.msra.mxu1 %v3377_v20  ;;  %v946_v15 = vld [vmem:[%s3260_s3 + $0x38] sm:$0xff] }
  0x70   :  { %1782 = vmatprep.subr.mxu0 %v3416_v16  ;;  %1809 = vmatprep.subr.mxu1 %v3379_v2 }
  0x71   :  { %1783 = vmatpush3.msra.mxu0 %v3417_v17  ;;  %1810 = vmatpush3.msra.mxu1 %v3380_v49  ;;  %v2951_v17 = vsub.f32 %v947_v5, %v2942_v11  ;;  %v939_v5 = vld [vmem:[%s3260_s3] sm:$0xff] }
  0x72   :  { %1784 = vmatprep.subr.mxu0 %v3418_v22  ;;  %1811 = vmatprep.subr.mxu1 %v3381_v43  ;;  %v2953_v22 = vand.u32 4294901760, %v946_v15 }
  0x73   :  { %1785 = vmatpush3.msra.mxu0 %v3419_v24  ;;  %1812 = vmatpush3.msra.mxu1 %v3382_v34  ;;  %v945_v24 = vld [vmem:[%s3260_s3 + $0x30] sm:$0xff] }
  0x74   :  { %1786 = vmatprep.subr.mxu0 %v3420_v60  ;;  %1813 = vmatprep.subr.mxu1 %v3383_v44 }
  0x75   :  { %1787 = vmatpush3.msra.mxu0 %v3421_v8  ;;  %1814 = vmatpush3.msra.mxu1 %v3384_v26  ;;  %v3339_v8 = vand.u32 4294901760, %v2951_v17 }
  0x76   :  { %1788 = vmatprep.subr.mxu0 %v3422_v42  ;;  %1815 = vmatprep.subr.mxu1 %v3385_v47  ;;  %v2963_v42 = vsub.f32 %v946_v15, %v2953_v22 }
  0x77   :  { %1789 = vmatpush3.msra.mxu0 %v3423_v36  ;;  %1816 = vmatpush3.msra.mxu1 %v3386_v7  ;;  %v2965_v36 = vand.u32 4294901760, %v945_v24  ;;  %v1106_v54 = vsub.f32 %v2951_v17, %v3339_v8 }
  0x78   :  { %1790 = vmatprep.subr.mxu0 %v3424_v48  ;;  %1817 = vmatprep.subr.mxu1 %v3387_v39  ;;  %v944_v48 = vld [vmem:[%s3260_s3 + $0x28] sm:$0xff] }
  0x79   :  { %1791 = vmatpush3.msra.mxu0 %v3426_v57  ;;  %1818 = vmatpush3.msra.mxu1 %v3427_v63  ;;  %v3338_v57 = vand.u32 4294901760, %v2963_v42  ;;  %v2978_v63 = vsub.f32 %v945_v24, %v2965_v36  ;;  %v2980_v6 = vand.u32 4294901760, %v944_v48 }
  0x7a   :  { %1792 = vmatprep.subr.mxu0 %v3429_v55  ;;  %1819 = vmatprep.subr.mxu1 %v3430_v58  ;;  %v943_v55 = vld [vmem:[%s3260_s3 + $0x20] sm:$0xff]  ;;  %v1107_v58 = vand.u32 4294901760, %v1106_v54 }
  0x7b   :  { %1793 = vmatpush3.msra.mxu0 %v3432_v1  ;;  %827 = vmatprep.mubr.f32.mxu0 %v3433_v37  ;;  %v1113_v50 = vsub.f32 %v2963_v42, %v3338_v57  ;;  %v3337_v1 = vand.u32 4294901760, %v2978_v63 }
  0x7c   :  { %1820 = vmatpush3.msra.mxu1 %v3434_v38  ;;  %829 = vmatmul.mubr.f32.vlgmr.msra.gmra.mxu0 %v3435_v30  ;;  %v2997_v38 = vand.u32 4294901760, %v943_v55 }
  0x7d   :  { %1821 = vmatprep.subr.mxu1 %v2464_v19  ;;  %931 = vmatprep.mubr.f32.mxu1 %v3433_v37  ;;  %v954_v19 = vld [vmem:[%s3260_s3 + $0x78] sm:$0xff]  ;;  %v2993_v37 = vsub.f32 %v944_v48, %v2980_v6 }
  0x7e   :  { %1822 = vmatpush3.msra.mxu1 %v3391_v21  ;;  %v2844_v32 = vand.u32 4294901760, %v954_v19  ;;  %v953_v21 = vld [vmem:[%s3260_s3 + $0x70] sm:$0xff]  ;;  %1934 = vmatprep.subr.mxu0 %v2197_v61 }
  0x7f   :  { %1823 = vmatprep.subr.mxu1 %v3393_v56  ;;  %v948_v56 = vld [vmem:[%s3260_s3 + $0x48] sm:$0xff]  ;;  %1966 = vmatprep.mubr.msk.f32.mxu0 %vm2198_vm0, %v2197_v61 }
  0x80   :  { %1824 = vmatpush3.msra.mxu1 %v3395_v46  ;;  %v2850_v52 = vsub.f32 %v954_v19, %v2844_v32  ;;  %v949_v46 = vld [vmem:[%s3260_s3 + $0x50] sm:$0xff]  ;;  %1935 = vmatpush3.msra.mxu0 %v2844_v32  ;;  %v2884_v51 = vand.u32 4294901760, %v948_v56  ;;  %v1114_v19 = vand.u32 4294901760, %v1113_v50 }
  0x81   :  { %1825 = vmatprep.subr.mxu1 %v3397_v27  ;;  %v2869_v27 = vand.u32 4294901760, %v950_v13  ;;  %v2882_v20 = vand.u32 4294901760, %v949_v46  ;;  %1936 = vmatprep.subr.mxu0 %v2197_v61 }
  0x82   :  { %1826 = vmatpush3.msra.mxu1 %v2530_v28  ;;  %v2852_v28 = vand.u32 4294901760, %v953_v21  ;;  %v1056_v39 = vand.u32 4294901760, %v2850_v52  ;;  %v2905_v47 = vsub.f32 %v948_v56, %v2884_v51 }
  0x83   :  { %1827 = vmatprep.subr.mxu1 %v2544_v41  ;;  %v952_v41 = vld [vmem:[%s3260_s3 + $0x68] sm:$0xff]  ;;  %v2893_v43 = vsub.f32 %v950_v13, %v2869_v27  ;;  %v2902_v26 = vsub.f32 %v949_v46, %v2882_v20  ;;  %v3012_v13 = vsub.f32 %v943_v55, %v2997_v38  ;;  %v941_v46 = vld [vmem:[%s3260_s3 + $0x10] sm:$0xff] }
  0x84   :  { %1828 = vmatpush3.msra.mxu1 %v2566_v12  ;;  %v951_v12 = vld [vmem:[%s3260_s3 + $0x60] sm:$0xff]  ;;  %v2864_v33 = vand.u32 4294901760, %v952_v41  ;;  %v2879_v53 = vsub.f32 %v953_v21, %v2852_v28  ;;  %v1057_v34 = vsub.f32 %v2850_v52, %v1056_v39  ;;  %1937 = vmatpush3.msra.mxu0 %v2852_v28  ;;  %v3340_v59 = vand.u32 4294901760, %v2905_v47 }
  0x85   :  { %933 = vmatmul.mubr.f32.vlgmr.msra.gmra.mxu1 %v3435_v30  ;;  %1969 = vmatprep.subr.mxu1 %v2197_v61  ;;  %v2866_v29 = vand.u32 4294901760, %v951_v12  ;;  %v1084_v23 = vand.u32 4294901760, %v2893_v43  ;;  %v3341_v62 = vand.u32 4294901760, %v2902_v26  ;;  %v942_v30 = vld [vmem:[%s3260_s3 + $0x18] sm:$0xff]  ;;  %v1120_v21 = vsub.f32 %v2978_v63, %v3337_v1 }
  0x86   :  { %v2887_v2 = vsub.f32 %v952_v41, %v2864_v33  ;;  %v1063_v44 = vand.u32 4294901760, %v2879_v53  ;;  %1938 = vmatprep.subr.mxu0 %v2197_v61  ;;  %v1058_v25 = vand.u32 4294901760, %v1057_v34  ;;  %v1099_v10 = vsub.f32 %v2905_v47, %v3340_v59  ;;  %2001 = vmatprep.mubr.msk.f32.mxu1 %vm2198_vm0, %v2197_v61 }
  0x87   :  { %v2890_v49 = vsub.f32 %v951_v12, %v2866_v29  ;;  %1939 = vmatpush3.msra.mxu0 %v2864_v33  ;;  %v1085_v45 = vsub.f32 %v2893_v43, %v1084_v23  ;;  %v1092_v4 = vsub.f32 %v2902_v26, %v3341_v62  ;;  %v3336_v41 = vand.u32 4294901760, %v2993_v37 }
  0x88   :  { %v1070_v7 = vand.u32 4294901760, %v2887_v2  ;;  %v1064_v31 = vsub.f32 %v2879_v53, %v1063_v44  ;;  %1940 = vmatprep.subr.mxu0 %v2197_v61  ;;  %1970 = vmatpush3.msra.mxu1 %v1058_v25  ;;  %v1100_v60 = vand.u32 4294901760, %v1099_v10  ;;  %v3007_v12 = vand.u32 4294901760, %v942_v30 }
  0x89   :  { %v1077_v18 = vand.u32 4294901760, %v2890_v49  ;;  %1941 = vmatpush3.msra.mxu0 %v2866_v29  ;;  %1971 = vmatprep.subr.mxu1 %v2197_v61  ;;  %v1086_v9 = vand.u32 4294901760, %v1085_v45  ;;  %v1093_v16 = vand.u32 4294901760, %v1092_v4  ;;  %v1121_v56 = vand.u32 4294901760, %v1120_v21 }
  0x8a   :  { %v1071_v35 = vsub.f32 %v2887_v2, %v1070_v7  ;;  %v1065_v40 = vand.u32 4294901760, %v1064_v31  ;;  %1942 = vmatprep.subr.mxu0 %v2197_v61  ;;  %v1127_v34 = vsub.f32 %v2993_v37, %v3336_v41  ;;  %v3022_v25 = vsub.f32 %v942_v30, %v3007_v12 }
  0x8b   :  { %v1078_v14 = vsub.f32 %v2890_v49, %v1077_v18  ;;  %1943 = vmatpush3.msra.mxu0 %v2869_v27  ;;  %v3024_v31 = vand.u32 4294901760, %v941_v46 }
  0x8c   :  { %v1072_v0 = vand.u32 4294901760, %v1071_v35  ;;  %1972 = vmatpush3.msra.mxu1 %v1065_v40  ;;  %1944 = vmatprep.subr.mxu0 %v2197_v61  ;;  %v3335_v35 = vand.u32 4294901760, %v3012_v13  ;;  %v1128_v40 = vand.u32 4294901760, %v1127_v34  ;;  %v3334_v45 = vand.u32 4294901760, %v3022_v25 }
  0x8d   :  { %v1079_v3 = vand.u32 4294901760, %v1078_v14  ;;  %1973 = vmatprep.subr.mxu1 %v2197_v61  ;;  %1945 = vmatpush3.msra.mxu0 %v2882_v20  ;;  %v940_v14 = vld [vmem:[%s3260_s3 + $0x8] sm:$0xff] }
  0x8e   :  { %1974 = vmatpush3.msra.mxu1 %v1072_v0  ;;  %1946 = vmatprep.subr.mxu0 %v2197_v61  ;;  %v3035_v0 = vsub.f32 %v941_v46, %v3024_v31  ;;  %v1134_v4 = vsub.f32 %v3012_v13, %v3335_v35 }
  0x8f   :  { %1975 = vmatprep.subr.mxu1 %v2197_v61  ;;  %1947 = vmatpush3.msra.mxu0 %v2884_v51 }
  0x90   :  { %1976 = vmatpush3.msra.mxu1 %v1079_v3  ;;  %1948 = vmatprep.subr.mxu0 %v2197_v61  ;;  %v3037_v3 = vand.u32 4294901760, %v940_v14  ;;  %v3333_v10 = vand.u32 4294901760, %v3035_v0  ;;  %v1135_v24 = vand.u32 4294901760, %v1134_v4 }
  0x91   :  { %1977 = vmatprep.subr.mxu1 %v2197_v61  ;;  %1949 = vmatpush3.msra.mxu0 %v2942_v11 }
  0x92   :  { %1978 = vmatpush3.msra.mxu1 %v1086_v9  ;;  %1950 = vmatprep.subr.mxu0 %v2197_v61  ;;  %v1141_v9 = vsub.f32 %v3022_v25, %v3334_v45  ;;  %v3053_v15 = vsub.f32 %v940_v14, %v3037_v3  ;;  %v1148_v48 = vsub.f32 %v3035_v0, %v3333_v10 }
  0x93   :  { %1979 = vmatprep.subr.mxu1 %v2197_v61  ;;  %1951 = vmatpush3.msra.mxu0 %v2953_v22 }
  0x94   :  { %1980 = vmatpush3.msra.mxu1 %v1093_v16  ;;  %1952 = vmatprep.subr.mxu0 %v2197_v61  ;;  %v3055_v16 = vand.u32 4294901760, %v939_v5  ;;  %v3332_v54 = vand.u32 4294901760, %v3053_v15 }
  0x95   :  { %1981 = vmatprep.subr.mxu1 %v2197_v61  ;;  %1953 = vmatpush3.msra.mxu0 %v2965_v36 }
  0x96   :  { %1982 = vmatpush3.msra.mxu1 %v1100_v60  ;;  %1954 = vmatprep.subr.mxu0 %v2197_v61  ;;  %v1142_v60 = vand.u32 4294901760, %v1141_v9  ;;  %v3065_v55 = vsub.f32 %v939_v5, %v3055_v16  ;;  %v1155_v50 = vsub.f32 %v3053_v15, %v3332_v54  ;;  %v1620_v9 = vld [vmem:[%s3259_s2] ss:$0 sm:$0xff] }
  0x97   :  { %1983 = vmatprep.subr.mxu1 %v2197_v61  ;;  %1955 = vmatpush3.msra.mxu0 %v2980_v6 }
  0x98   :  { %1984 = vmatpush3.msra.mxu1 %v1107_v58  ;;  %1956 = vmatprep.subr.mxu0 %v2197_v61  ;;  %v1149_v58 = vand.u32 4294901760, %v1148_v48  ;;  %v3331_v30 = vand.u32 4294901760, %v3065_v55 }
  0x99   :  { %1985 = vmatprep.subr.mxu1 %v2197_v61  ;;  %1957 = vmatpush3.msra.mxu0 %v2997_v38 }
  0x9a   :  { %1986 = vmatpush3.msra.mxu1 %v1114_v19  ;;  %1958 = vmatprep.subr.mxu0 %v2197_v61  ;;  %v1156_v19 = vand.u32 4294901760, %v1155_v50  ;;  %v1162_v21 = vsub.f32 %v3065_v55, %v3331_v30 }
  0x9b   :  { %1987 = vmatprep.subr.mxu1 %v2197_v61  ;;  %1959 = vmatpush3.msra.mxu0 %v3007_v12 }
  0x9c   :  { %1988 = vmatpush3.msra.mxu1 %v1121_v56  ;;  %1960 = vmatprep.subr.mxu0 %v2197_v61  ;;  %v1163_v46 = vand.u32 4294901760, %v1162_v21 }
  0x9d   :  { %1989 = vmatprep.subr.mxu1 %v2197_v61  ;;  %1961 = vmatpush3.msra.mxu0 %v3024_v31 }
  0x9e   :  { %1990 = vmatpush3.msra.mxu1 %v1128_v40  ;;  %1962 = vmatprep.subr.mxu0 %v2197_v61 }
  0x9f   :  { %1991 = vmatprep.subr.mxu1 %v2197_v61  ;;  %1963 = vmatpush3.msra.mxu0 %v3037_v3 }
  0xa0   :  { %1992 = vmatpush3.msra.mxu1 %v1135_v24  ;;  %1964 = vmatprep.subr.mxu0 %v2197_v61 }
  0xa1   :  { %1993 = vmatprep.subr.mxu1 %v2197_v61  ;;  %1965 = vmatpush3.msra.mxu0 %v3055_v16 }
  0xa2   :  { %1994 = vmatpush3.msra.mxu1 %v1142_v60  ;;  %2004 = vmatprep.subr.mxu0 %v2197_v61 }
  0xa3   :  { %1995 = vmatprep.subr.mxu1 %v2197_v61 }
  0xa4   :  { %1996 = vmatpush3.msra.mxu1 %v1149_v58 }
  0xa5   :  { %1997 = vmatprep.subr.mxu1 %v2197_v61 }
  0xa6   :  { %1998 = vmatpush3.msra.mxu1 %v1156_v19 }
  0xa7   :  { %1999 = vmatprep.subr.mxu1 %v2197_v61 }
  0xa8   :  { %2000 = vmatpush3.msra.mxu1 %v1163_v46 }
  0xa9   :  { %2039 = vmatprep.subr.mxu1 %v2197_v61 }
  0xf9   :  { %v1654_v56 = vpop.f32.mrf.mxu0 }
  0xfb   :  { %v1655_v34 = vpop.f32.mrf.mxu0 }
  0xfc   :  { %v1656_v5 = vadd.f32 %v1655_v34, %v1654_v56 }
  0xfe   :  { %v185_v58 = vadd.f32 %v1656_v5, %v1620_v9 }
 0x102   :  { %v1689_v14 = vpop.f32.mrf.mxu1 }
 0x104   :  { %v1690_v4 = vpop.f32.mrf.mxu1 }
 0x105   :  { %v1691_v50 = vadd.f32 %v1690_v4, %v1689_v14 }
 0x107   :  { %v417_v30 = vadd.f32 %v1691_v50, %v185_v58 }
 0x11a   :  { %v1724_v40 = vpop.f32.mrf.mxu0 }
 0x11c   :  { %v1725_v24 = vpop.f32.mrf.mxu0 }
 0x11d   :  { %v1726_v21 = vadd.f32 %v1725_v24, %v1724_v40 }
 0x11f   :  { %v555_v10 = vadd.f32 %v1726_v21, %v417_v30 }
 0x123   :  { %v1759_v60 = vpop.f32.mrf.mxu1 }
 0x125   :  { %v1760_v19 = vpop.f32.mrf.mxu1 }
 0x126   :  { %v1761_v54 = vadd.f32 %v1760_v19, %v1759_v60 }
 0x128   :  { %v663_v41 = vadd.f32 %v1761_v54, %v555_v10 }
 0x13c   :  { %v1794_v48 = vpop.f32.mrf.mxu0 }
 0x13e   :  { %v1795_v46 = vpop.f32.mrf.mxu0 }
 0x13f   :  { %v1796_v45 = vadd.f32 %v1795_v46, %v1794_v48 }
 0x141   :  { %v831_v56 = vadd.f32 %v1796_v45, %v663_v41 }
 0x145   :  { %v1829_v35 = vpop.f32.mrf.mxu1 }
 0x147   :  { %v1830_v1 = vpop.f32.mrf.mxu1 }
 0x148   :  { %v1831_v34 = vadd.f32 %v1830_v1, %v1829_v35 }
 0x14a   :  { %v935_v57 = vadd.f32 %v1831_v34, %v831_v56 }
 0x14c   :  { %v938_v8 = vmax.f32 %v935_v57, 0.0 }
 0x14e   :  { %v3090_v59 = vand.u32 4294901760, %v938_v8 }
 0x150   :  { %v3093_v62 = vsub.f32 %v938_v8, %v3090_v59  ;;  %2002 = vmatmul.mubr.f32.vlgmr.msra.gmra.mxu1 %v3090_v59 }
 0x151   :  { %2040 = vmatpush3.msra.mxu1 %v2844_v32  ;;  %2071 = vmatprep.mubr.msk.f32.mxu1 %vm2198_vm0, %v2197_v61 }
 0x152   :  { %v1045_v30 = vand.u32 4294901760, %v3093_v62  ;;  %2041 = vmatprep.subr.mxu1 %v2197_v61 }
 0x153   :  { %2042 = vmatpush3.msra.mxu1 %v2852_v28 }
 0x154   :  { %2043 = vmatprep.subr.mxu1 %v2197_v61  ;;  %v1046_v57 = vsub.f32 %v3093_v62, %v1045_v30 }
 0x155   :  { %2044 = vmatpush3.msra.mxu1 %v2864_v33 }
 0x156   :  { %2045 = vmatprep.subr.mxu1 %v2197_v61  ;;  %v1047_v8 = vand.u32 4294901760, %v1046_v57 }
 0x157   :  { %2046 = vmatpush3.msra.mxu1 %v2866_v29 }
 0x158   :  { %2047 = vmatprep.subr.mxu1 %v2197_v61  ;;  %1967 = vmatmul.mubr.f32.vlgmr.msra.gmra.mxu0 %v1047_v8 }
 0x159   :  { %2005 = vmatpush3.msra.mxu0 %v2850_v52  ;;  %2048 = vmatpush3.msra.mxu1 %v2869_v27  ;;  %v3437_v52 = vand.u32 4294901760, %v2905_v47 }
 0x15a   :  { %2006 = vmatprep.subr.mxu0 %v2197_v61  ;;  %2049 = vmatprep.subr.mxu1 %v2197_v61 }
 0x15b   :  { %2007 = vmatpush3.msra.mxu0 %v2879_v53  ;;  %2050 = vmatpush3.msra.mxu1 %v2882_v20  ;;  %v3443_v53 = vand.u32 4294901760, %v3022_v25 }
 0x15c   :  { %2008 = vmatprep.subr.mxu0 %v2197_v61  ;;  %2051 = vmatprep.subr.mxu1 %v2197_v61 }
 0x15d   :  { %2009 = vmatpush3.msra.mxu0 %v2887_v2  ;;  %2052 = vmatpush3.msra.mxu1 %v2884_v51  ;;  %v3446_v2 = vand.u32 4294901760, %v3065_v55 }
 0x15e   :  { %2010 = vmatprep.subr.mxu0 %v2197_v61  ;;  %2053 = vmatprep.subr.mxu1 %v2197_v61 }
 0x15f   :  { %2011 = vmatpush3.msra.mxu0 %v2890_v49  ;;  %2054 = vmatpush3.msra.mxu1 %v2942_v11 }
 0x160   :  { %2012 = vmatprep.subr.mxu0 %v2197_v61  ;;  %2055 = vmatprep.subr.mxu1 %v2197_v61 }
 0x161   :  { %2013 = vmatpush3.msra.mxu0 %v2893_v43  ;;  %2056 = vmatpush3.msra.mxu1 %v2953_v22 }
 0x162   :  { %2014 = vmatprep.subr.mxu0 %v2197_v61  ;;  %2057 = vmatprep.subr.mxu1 %v2197_v61 }
 0x163   :  { %2015 = vmatpush3.msra.mxu0 %v2902_v26  ;;  %2058 = vmatpush3.msra.mxu1 %v2965_v36 }
 0x164   :  { %2016 = vmatprep.subr.mxu0 %v2197_v61  ;;  %2059 = vmatprep.subr.mxu1 %v2197_v61 }
 0x165   :  { %2017 = vmatpush3.msra.mxu0 %v2905_v47  ;;  %2060 = vmatpush3.msra.mxu1 %v2980_v6 }
 0x166   :  { %2018 = vmatprep.subr.mxu0 %v2197_v61  ;;  %2061 = vmatprep.subr.mxu1 %v2197_v61 }
 0x167   :  { %2019 = vmatpush3.msra.mxu0 %v2951_v17  ;;  %2062 = vmatpush3.msra.mxu1 %v2997_v38 }
 0x168   :  { %2020 = vmatprep.subr.mxu0 %v2197_v61  ;;  %2063 = vmatprep.subr.mxu1 %v2197_v61 }
 0x169   :  { %2021 = vmatpush3.msra.mxu0 %v2963_v42  ;;  %2064 = vmatpush3.msra.mxu1 %v3007_v12 }
 0x16a   :  { %2022 = vmatprep.subr.mxu0 %v2197_v61  ;;  %2065 = vmatprep.subr.mxu1 %v2197_v61 }
 0x16b   :  { %2023 = vmatpush3.msra.mxu0 %v2978_v63  ;;  %2066 = vmatpush3.msra.mxu1 %v3024_v31 }
 0x16c   :  { %2024 = vmatprep.subr.mxu0 %v2197_v61  ;;  %2067 = vmatprep.subr.mxu1 %v2197_v61 }
 0x16d   :  { %2025 = vmatpush3.msra.mxu0 %v2993_v37  ;;  %2068 = vmatpush3.msra.mxu1 %v3037_v3 }
 0x16e   :  { %2026 = vmatprep.subr.mxu0 %v2197_v61  ;;  %2069 = vmatprep.subr.mxu1 %v2197_v61 }
 0x16f   :  { %2027 = vmatpush3.msra.mxu0 %v3012_v13  ;;  %2070 = vmatpush3.msra.mxu1 %v3055_v16 }
 0x170   :  { %2028 = vmatprep.subr.mxu0 %v2197_v61  ;;  %2072 = vmatmul.mubr.f32.vlgmr.msra.gmra.mxu1 %v1045_v30 }
 0x171   :  { %2109 = vmatprep.subr.mxu1 %v2197_v61  ;;  %2029 = vmatpush3.msra.mxu0 %v3022_v25 }
 0x172   :  { %2110 = vmatpush3.msra.mxu1 %v2844_v32  ;;  %2030 = vmatprep.subr.mxu0 %v2197_v61  ;;  %v3436_v32 = vand.u32 4294901760, %v2902_v26 }
 0x173   :  { %2111 = vmatprep.subr.mxu1 %v2197_v61  ;;  %2031 = vmatpush3.msra.mxu0 %v3035_v0 }
 0x174   :  { %2112 = vmatpush3.msra.mxu1 %v2852_v28  ;;  %2032 = vmatprep.subr.mxu0 %v2197_v61  ;;  %v3438_v28 = vand.u32 4294901760, %v2951_v17 }
 0x175   :  { %2113 = vmatprep.subr.mxu1 %v2197_v61  ;;  %2033 = vmatpush3.msra.mxu0 %v3053_v15 }
 0x176   :  { %2114 = vmatpush3.msra.mxu1 %v2864_v33  ;;  %2034 = vmatprep.subr.mxu0 %v2197_v61  ;;  %v3439_v33 = vand.u32 4294901760, %v2963_v42 }
 0x177   :  { %2115 = vmatprep.subr.mxu1 %v2197_v61  ;;  %2035 = vmatpush3.msra.mxu0 %v3065_v55 }
 0x178   :  { %2036 = vmatprep.mubr.msk.f32.mxu0 %vm2198_vm0, %v2197_v61  ;;  %2116 = vmatpush3.msra.mxu1 %v2866_v29  ;;  %v3440_v29 = vand.u32 4294901760, %v2978_v63 }
 0x179   :  { %2037 = vmatmul.mubr.f32.vlgmr.msra.gmra.mxu0 %v3093_v62  ;;  %2074 = vmatprep.subr.mxu0 %v2197_v61  ;;  %v1621_v62 = vld [vmem:[%s3261_s4] ss:$0 sm:$0xff] }
 0x17a   :  { %2117 = vmatprep.subr.mxu1 %v2197_v61  ;;  %2075 = vmatpush3.msra.mxu0 %v1056_v39  ;;  %v3442_v39 = vand.u32 4294901760, %v3012_v13 }
 0x17b   :  { %2118 = vmatpush3.msra.mxu1 %v2869_v27  ;;  %2076 = vmatprep.subr.mxu0 %v2197_v61  ;;  %v3441_v27 = vand.u32 4294901760, %v2993_v37 }
 0x17c   :  { %2119 = vmatprep.subr.mxu1 %v2197_v61  ;;  %2077 = vmatpush3.msra.mxu0 %v1063_v44 }
 0x17d   :  { %2120 = vmatpush3.msra.mxu1 %v2882_v20  ;;  %2078 = vmatprep.subr.mxu0 %v2197_v61  ;;  %v3444_v20 = vand.u32 4294901760, %v3035_v0 }
 0x17e   :  { %2121 = vmatprep.subr.mxu1 %v2197_v61  ;;  %2079 = vmatpush3.msra.mxu0 %v1070_v7 }
 0x17f   :  { %2122 = vmatpush3.msra.mxu1 %v2884_v51  ;;  %2080 = vmatprep.subr.mxu0 %v2197_v61  ;;  %v3445_v51 = vand.u32 4294901760, %v3053_v15 }
 0x180   :  { %2123 = vmatprep.subr.mxu1 %v2197_v61  ;;  %2081 = vmatpush3.msra.mxu0 %v1077_v18 }
 0x181   :  { %2124 = vmatpush3.msra.mxu1 %v2942_v11  ;;  %2082 = vmatprep.subr.mxu0 %v2197_v61 }
 0x182   :  { %2125 = vmatprep.subr.mxu1 %v2197_v61  ;;  %2083 = vmatpush3.msra.mxu0 %v1084_v23 }
 0x183   :  { %2126 = vmatpush3.msra.mxu1 %v2953_v22  ;;  %2084 = vmatprep.subr.mxu0 %v2197_v61 }
 0x184   :  { %2127 = vmatprep.subr.mxu1 %v2197_v61  ;;  %2085 = vmatpush3.msra.mxu0 %v3436_v32 }
 0x185   :  { %2128 = vmatpush3.msra.mxu1 %v2965_v36  ;;  %2086 = vmatprep.subr.mxu0 %v2197_v61 }
 0x186   :  { %2129 = vmatprep.subr.mxu1 %v2197_v61  ;;  %2087 = vmatpush3.msra.mxu0 %v3437_v52 }
 0x187   :  { %2130 = vmatpush3.msra.mxu1 %v2980_v6  ;;  %2088 = vmatprep.subr.mxu0 %v2197_v61 }
 0x188   :  { %2131 = vmatprep.subr.mxu1 %v2197_v61  ;;  %2089 = vmatpush3.msra.mxu0 %v3438_v28 }
 0x189   :  { %2132 = vmatpush3.msra.mxu1 %v2997_v38  ;;  %2090 = vmatprep.subr.mxu0 %v2197_v61 }
 0x18a   :  { %2133 = vmatprep.subr.mxu1 %v2197_v61  ;;  %2091 = vmatpush3.msra.mxu0 %v3439_v33 }
 0x18b   :  { %2134 = vmatpush3.msra.mxu1 %v3007_v12  ;;  %2092 = vmatprep.subr.mxu0 %v2197_v61 }
 0x18c   :  { %2135 = vmatprep.subr.mxu1 %v2197_v61  ;;  %2093 = vmatpush3.msra.mxu0 %v3440_v29 }
 0x18d   :  { %2136 = vmatpush3.msra.mxu1 %v3024_v31  ;;  %2094 = vmatprep.subr.mxu0 %v2197_v61 }
 0x18e   :  { %2137 = vmatprep.subr.mxu1 %v2197_v61  ;;  %2095 = vmatpush3.msra.mxu0 %v3441_v27 }
 0x18f   :  { %2138 = vmatpush3.msra.mxu1 %v3037_v3  ;;  %2096 = vmatprep.subr.mxu0 %v2197_v61 }
 0x190   :  { %2139 = vmatprep.subr.mxu1 %v2197_v61  ;;  %2097 = vmatpush3.msra.mxu0 %v3442_v39 }
 0x191   :  { %2140 = vmatpush3.msra.mxu1 %v3055_v16  ;;  %2141 = vmatprep.mubr.msk.f32.mxu1 %vm2198_vm0, %v2197_v61 }
 0x192   :  { %2098 = vmatprep.subr.mxu0 %v2197_v61  ;;  %2142 = vmatmul.mubr.f32.vlgmr.msra.gmra.mxu1 %v3090_v59 }
 0x193   :  { %2099 = vmatpush3.msra.mxu0 %v3443_v53  ;;  %2106 = vmatprep.mubr.msk.f32.mxu0 %vm2198_vm0, %v2197_v61 }
 0x194   :  { %2100 = vmatprep.subr.mxu0 %v2197_v61 }
 0x195   :  { %2101 = vmatpush3.msra.mxu0 %v3444_v20 }
 0x196   :  { %2102 = vmatprep.subr.mxu0 %v2197_v61 }
 0x197   :  { %2103 = vmatpush3.msra.mxu0 %v3445_v51 }
 0x198   :  { %2104 = vmatprep.subr.mxu0 %v2197_v61 }
 0x199   :  { %2105 = vmatpush3.msra.mxu0 %v3446_v2 }
 0x19a   :  { %2107 = vmatmul.mubr.f32.vlgmr.msra.gmra.mxu0 %v3090_v59 }
 0x210   :  { %v1200_v49 = vpop.f32.mrf.mxu1 }
 0x212   :  { %v2003_v43 = vpop.f32.mrf.mxu1 }
 0x218   :  { %v1049_v44 = vpop.f32.mrf.mxu0 }
 0x219   :  { %v1050_v11 = vadd.f32 %v1621_v62, %v1049_v44 }
 0x21a   :  { %v1968_v26 = vpop.f32.mrf.mxu0 }
 0x21b   :  { %v1201_v61 = vadd.f32 %v1200_v49, %v1050_v11 }
 0x230   :  { %v1393_v47 = vpop.f32.mrf.mxu1 }
 0x232   :  { %v2073_v7 = vpop.f32.mrf.mxu1 }
 0x239   :  { %v1304_v18 = vpop.f32.mrf.mxu0 }
 0x23a   :  { %v1305_v42 = vadd.f32 %v1304_v18, %v1201_v61 }
 0x23b   :  { %v2038_v23 = vpop.f32.mrf.mxu0 }
 0x23c   :  { %v1394_v36 = vadd.f32 %v1393_v47, %v1305_v42 }
 0x252   :  { %v1599_v17 = vpop.f32.mrf.mxu1 }
 0x254   :  { %v2143_v22 = vpop.f32.mrf.mxu1 }
 0x25a   :  { %v1512_v63 = vpop.f32.mrf.mxu0 }
 0x25b   :  { %v1513_v59 = vadd.f32 %v1512_v63, %v1394_v36 }
 0x25c   :  { %v2108_v6 = vpop.f32.mrf.mxu0 }
 0x25d   :  { %v1600_v1 = vadd.f32 %v1599_v17, %v1513_v59 }
 0x25f   :  { %1604 = vst.msk [vmem:[#allocation5] sm:$0xff] %vm1603_vm1, %v1600_v1 }
 0x260   :  { %2181 = shalt.err (!%p2178_p9)
}
 0x261   :  { %1614 = dma.vmem_to_hbm [thread:$0]  %s1612_s10, 128, %s3262_s5, [#allocation4]  }
 0x262   :  { %2192 = dma.done.wait [#allocation4], 128  }
 0x263   :  { %2193 = vsyncadd [#allocation4], 4294967168 }
 0x264   :  { %1618 = vsyncpa [#allocation3], 1 }
 0x265   :  { %1619 = vsyncpa [#allocation4], 1 }

</bundles_post_ra>
